<compile_context>
chip_gen: v7x
topology: tpu7x:2x2x1
jax: 0.10.0
libtpu: 0.0.40
codegen_flags: <defaults>
</compile_context>

<pallas_src>
import math
import numpy as np
import jax
import jax.numpy as jnp
from jax.experimental import pallas as pl
from jax.experimental.pallas import tpu as pltpu

LOG_2PI = math.log(2.0 * math.pi)


def cosine_alpha_hat(num_steps=1000, s=0.008):
    """Replicates the buffers built in Diffoot.__init__ (float64 schedule)."""
    steps = num_steps + 1
    x = np.linspace(0, num_steps, steps, dtype=np.float64)
    ac = np.cos((x / num_steps + s) / (1 + s) * np.pi * 0.5) ** 2
    ac = ac / ac[0]
    betas = 1.0 - ac[1:] / ac[:-1]
    betas = np.clip(betas, 0.0001, 0.9999).astype(np.float32)
    alphas = 1.0 - betas
    alpha_hat = np.cumprod(alphas, axis=0)
    return jnp.asarray(alpha_hat)


def _diffoot_kernel(w_ref, params_ref, rcx_ref, rcy_ref, p_ref,
                    tx_ref, ty_ref, nx_ref, ny_ref, out_ref):
    s_len = tx_ref.shape[1]

    # SMEM scalars: [w00, w01, w10, w11, w20, w21, w30, w31, a_x, a_y]
    ax = w_ref[8]
    ay = w_ref[9]

    sa = params_ref[:, 0:1]      # (bb, 1) sqrt(alpha_hat[t])
    so = params_ref[:, 1:2]      # (bb, 1) sqrt(1 - alpha_hat[t])
    b0 = params_ref[:, 2:3]      # per-batch conv bias + timestep embedding
    b1 = params_ref[:, 3:4]
    b2 = params_ref[:, 4:5]
    b3 = params_ref[:, 5:6]
    valid = params_ref[:, 6:7]   # 1.0 for real batch rows, 0.0 for padding

    # Reference broadcast over T on the MXU: exact bf16 hi/lo x one-hot matmul.
    pm = p_ref[...].astype(jnp.bfloat16)
    rbx = jnp.dot(rcx_ref[...].astype(jnp.bfloat16), pm,
                  preferred_element_type=jnp.float32)        # (bb, S)
    rby = jnp.dot(rcy_ref[...].astype(jnp.bfloat16), pm,
                  preferred_element_type=jnp.float32)

    # de-normalize -> relative-to-reference -> re-normalize, folded to one FMA.
    x0x = tx_ref[...] * ax + rbx
    x0y = ty_ref[...] * ay + rby

    nxv = nx_ref[...]
    nyv = ny_ref[...]
    xtx = sa * x0x + so * nxv        # q_sample
    xty = sa * x0y + so * nyv
    vtx = sa * nxv - so * x0x        # v-parameterization target
    vty = sa * nyv - so * x0y

    # Stand-in denoiser: 1x1 conv (2 -> 4) + bias + timestep embedding as VPU
    # FMAs between the two planes (no MXU / no channel padding).
    vpx = w_ref[0] * xtx + w_ref[1] * xty + b0
    vpy = w_ref[2] * xtx + w_ref[3] * xty + b1
    lvx = jnp.clip(w_ref[4] * xtx + w_ref[5] * xty + b2, -10.0, 2.0)
    lvy = jnp.clip(w_ref[6] * xtx + w_ref[7] * xty + b3, -10.0, 2.0)

    dx = vpx - vtx
    dy = vpy - vty
    sqx = dx * dx
    sqy = dy * dy
    sq = sqx + sqy
    # exp(-log_var) rides the EUP slot instead of a VALU divide chain.
    nll = 0.5 * (sqx * jnp.exp(-lvx) + lvx + sqy * jnp.exp(-lvy) + lvy
                 + 2.0 * LOG_2PI)

    # Lane-dense partial sums: fold S into 128-lane chunks (static lane-aligned
    # slices = free vreg selection), mask padded rows, one tiny sublane sum.
    def lane_fold(x):
        if s_len <= 128:
            return x if s_len == 128 else jnp.pad(x, ((0, 0), (0, 128 - s_len)))
        nf = s_len // 128
        acc = x[:, 0:128]
        for j in range(1, nf):
            acc = acc + x[:, j * 128:(j + 1) * 128]
        rem = s_len - nf * 128
        if rem:
            acc = acc + jnp.pad(x[:, nf * 128:], ((0, 0), (0, 128 - rem)))
        return acc

    sse_rows = lane_fold(sq) * valid
    nll_rows = lane_fold(nll) * valid
    sse_lane = jnp.sum(sse_rows, axis=0, keepdims=True)      # (1, 128)
    nll_lane = jnp.sum(nll_rows, axis=0, keepdims=True)      # (1, 128)

    rows_out = out_ref.shape[1]
    row = jax.lax.broadcasted_iota(jnp.int32, (rows_out, 128), 0)
    blk = (jnp.where(row == 0, sse_lane, 0.0)
           + jnp.where(row == 1, nll_lane, 0.0))
    out_ref[0] = blk


def _grid_shape(B):
    block_b = 8                       # full sublane density inside each block
    G = -(-B // block_b)
    if B > block_b and G % 2 == 1:
        G += 1                        # keep v7x's two TensorCores balanced
    return block_b, G


def diffoot_forward(target_abs, reference_point, zscore_stats, t,
                    noise_x, noise_y, w, conv_b, t_emb, alpha_hat):
    """Returns (v_loss, noise_nll), matching Diffoot.forward semantics."""
    f32 = jnp.float32
    B, T, twoN = target_abs.shape
    N = twoN // 2
    S = T * N

    # ---- split x/y planes: target via one strided slice (no transpose);
    # noise is already supplied as planes (generated in-layout). ----
    t4 = target_abs.reshape(B, T, N, 2).astype(f32)
    tgt_x = t4[..., 0].reshape(B, S)
    tgt_y = t4[..., 1].reshape(B, S)
    ns_x = noise_x.astype(f32).reshape(B, S)
    ns_y = noise_y.astype(f32).reshape(B, S)

    if zscore_stats is None:
        zs = dict(player_x_mean=0.0, player_x_std=1.0,
                  player_y_mean=0.0, player_y_std=1.0,
                  rel_x_mean=0.0, rel_x_std=1.0,
                  rel_y_mean=0.0, rel_y_std=1.0)
    else:
        zs = zscore_stats
    a_x = zs['player_x_std'] / zs['rel_x_std']
    a_y = zs['player_y_std'] / zs['rel_y_std']
    c_x = (zs['player_x_mean'] - zs['rel_x_mean']) / zs['rel_x_std']
    c_y = (zs['player_y_mean'] - zs['rel_y_mean']) / zs['rel_y_std']

    ref2 = reference_point.reshape(B, N, 2).astype(f32)
    rc_x = c_x - ref2[..., 0] / zs['rel_x_std']              # (B, N)
    rc_y = c_y - ref2[..., 1] / zs['rel_y_std']

    # bf16 hi/lo split so the one-hot MXU broadcast is numerically exact.
    def hi_lo(x):
        hi = x.astype(jnp.bfloat16).astype(f32)
        return jnp.concatenate([hi, x - hi], axis=1)         # (B, 2N)
    rcx2 = hi_lo(rc_x)
    rcy2 = hi_lo(rc_y)

    # One-hot replication: column t*N+n selects player n (stacked for hi/lo).
    p1 = jnp.tile(jnp.eye(N, dtype=f32), (1, T))             # (N, S)
    p2 = jnp.concatenate([p1, p1], axis=0)                   # (2N, S)

    a_hat_t = alpha_hat[t].astype(f32)
    sa = jnp.sqrt(a_hat_t)
    so = jnp.sqrt(1.0 - a_hat_t)
    bias_total = (conv_b[None, :] + t_emb[t]).astype(f32)    # (B, 4)
    params = jnp.concatenate(
        [sa[:, None], so[:, None], bias_total,
         jnp.ones((B, 1), f32), jnp.zeros((B, 1), f32)], axis=1)   # (B, 8)

    # 8 conv weights + 2 z-score scales -> SMEM scalar path.
    w_smem = jnp.concatenate(
        [w.reshape(-1).astype(f32), jnp.array([a_x, a_y], f32)])   # (10,)

    block_b, G = _grid_shape(B)
    BP = block_b * G
    if BP != B:
        pad = [(0, BP - B), (0, 0)]
        params = jnp.pad(params, pad)        # padded rows get valid = 0
        rcx2 = jnp.pad(rcx2, pad)
        rcy2 = jnp.pad(rcy2, pad)
        tgt_x = jnp.pad(tgt_x, pad)
        tgt_y = jnp.pad(tgt_y, pad)
        ns_x = jnp.pad(ns_x, pad)
        ns_y = jnp.pad(ns_y, pad)

    out = pl.pallas_call(
        _diffoot_kernel,
        out_shape=jax.ShapeDtypeStruct((G, 8, 128), f32),
        grid=(G,),
        in_specs=[
            pl.BlockSpec(memory_space=pltpu.MemorySpace.SMEM),   # conv w + a_x, a_y
            pl.BlockSpec((block_b, 8), lambda g: (g, 0)),        # sa, so, biases, valid
            pl.BlockSpec((block_b, 2 * N), lambda g: (g, 0)),    # rc_x hi/lo
            pl.BlockSpec((block_b, 2 * N), lambda g: (g, 0)),    # rc_y hi/lo
            pl.BlockSpec((2 * N, S), lambda g: (0, 0)),          # one-hot P (resident)
            pl.BlockSpec((block_b, S), lambda g: (g, 0)),        # target x plane
            pl.BlockSpec((block_b, S), lambda g: (g, 0)),        # target y plane
            pl.BlockSpec((block_b, S), lambda g: (g, 0)),        # noise x plane
            pl.BlockSpec((block_b, S), lambda g: (g, 0)),        # noise y plane
        ],
        out_specs=pl.BlockSpec((1, 8, 128), lambda g: (g, 0, 0)),
        compiler_params=pltpu.CompilerParams(
            dimension_semantics=("parallel",),
            vmem_limit_bytes=32 * 1024 * 1024),
    )(w_smem, params, rcx2, rcy2, p2, tgt_x, tgt_y, ns_x, ns_y)

    total = B * S * 2
    v_loss = jnp.sum(out[:, 0, :]) / total
    noise_nll = jnp.sum(out[:, 1, :]) / total
    return v_loss, noise_nll


def diffoot_reference(target_abs, reference_point, zscore_stats, t,
                      noise_x, noise_y, w, conv_b, t_emb, alpha_hat):
    """Pure-JAX mirror of the PyTorch forward (same stand-in model)."""
    B, T, twoN = target_abs.shape
    N = twoN // 2
    tgt4 = target_abs.reshape(B, T, N, 2)
    ref = reference_point.reshape(B, N, 2)
    if zscore_stats is not None:
        zs = zscore_stats
        abs_raw = jnp.stack(
            [tgt4[..., 0] * zs['player_x_std'] + zs['player_x_mean'],
             tgt4[..., 1] * zs['player_y_std'] + zs['player_y_mean']], -1)
        rel_raw = abs_raw - ref[:, None]
        x0 = jnp.stack([(rel_raw[..., 0] - zs['rel_x_mean']) / zs['rel_x_std'],
                        (rel_raw[..., 1] - zs['rel_y_mean']) / zs['rel_y_std']], -1)
    else:
        x0 = tgt4 - ref[:, None]
    noise4 = jnp.stack([noise_x, noise_y], axis=-1)          # (B, T, N, 2)
    a_hat = alpha_hat[t][:, None, None, None]
    sa = jnp.sqrt(a_hat)
    so = jnp.sqrt(1.0 - a_hat)
    x_t = sa * x0 + so * noise4
    v_target = sa * noise4 - so * x0
    z = (jnp.einsum('btnk,ck->btnc', x_t, w)
         + (conv_b[None, :] + t_emb[t])[:, None, None, :])
    v_pred = z[..., :2]
    log_var = jnp.clip(z[..., 2:], -10.0, 2.0)
    var = jnp.exp(log_var)
    v_loss = jnp.mean((v_pred - v_target) ** 2)
    nll = 0.5 * ((v_target - v_pred) ** 2 / var + log_var + LOG_2PI)
    return v_loss, jnp.mean(nll)


if __name__ == "__main__":
    B, T, N = 2, 16, 8          # batch, time frames, players -> S = T*N = 128 lanes
    num_steps = 1000

    key = jax.random.PRNGKey(0)
    k_tgt, k_ref, k_t, k_nx, k_ny, k_w, k_b, k_emb = jax.random.split(key, 8)

    target_abs = jax.random.normal(k_tgt, (B, T, 2 * N), dtype=jnp.float32)
    reference_point = jax.random.normal(k_ref, (B, 2 * N), dtype=jnp.float32) * 10.0
    t = jax.random.randint(k_t, (B,), 0, num_steps)          # like torch.randint
    # noise is i.i.d. Gaussian (torch.randn_like in q_sample), so it is sampled
    # directly in the kernel's x/y-plane layout -- no HBM relayout ever happens.
    noise_x = jax.random.normal(k_nx, (B, T, N), dtype=jnp.float32)
    noise_y = jax.random.normal(k_ny, (B, T, N), dtype=jnp.float32)

    # TODO(synk): `model` passed to Diffoot.__init__ is external/unspecified; stand-in is a
    # deterministic 1x1 Conv2d(2 -> 4) plus an additive timestep-embedding lookup.
    w = jax.random.normal(k_w, (4, 2), dtype=jnp.float32) * 0.5
    conv_b = jax.random.normal(k_b, (4,), dtype=jnp.float32) * 0.1
    t_emb = 0.05 * jax.random.normal(k_emb, (num_steps, 4), dtype=jnp.float32)

    zscore_stats = dict(player_x_mean=52.5, player_x_std=30.0,
                        player_y_mean=34.0, player_y_std=20.0,
                        rel_x_mean=0.0, rel_x_std=15.0,
                        rel_y_mean=0.0, rel_y_std=10.0)
    # (passing stats with std=1, mean=0 reproduces the `zscore_stats is None` branch)

    alpha_hat = cosine_alpha_hat(num_steps)

    v_loss, noise_nll = diffoot_forward(target_abs, reference_point, zscore_stats,
                                        t, noise_x, noise_y, w, conv_b, t_emb,
                                        alpha_hat)
    jax.block_until_ready((v_loss, noise_nll))

    rv, rn = diffoot_reference(target_abs, reference_point, zscore_stats,
                               t, noise_x, noise_y, w, conv_b, t_emb, alpha_hat)
    np.testing.assert_allclose(np.array([float(v_loss), float(noise_nll)]),
                               np.array([float(rv), float(rn)]),
                               rtol=2e-3, atol=1e-4)
    print("KERNEL_OK")
</pallas_src>

<mosaic_0001>
module attributes {stable_mosaic.version = 11 : i64} {
  func.func @_diffoot_kernel(%arg0: i32, %arg1: memref<10xf32, #tpu.memory_space<smem>>, %arg2: memref<8x8xf32, #tpu.memory_space<vmem>>, %arg3: memref<8x16xf32, #tpu.memory_space<vmem>>, %arg4: memref<8x16xf32, #tpu.memory_space<vmem>>, %arg5: memref<16x128xf32, #tpu.memory_space<vmem>>, %arg6: memref<8x128xf32, #tpu.memory_space<vmem>>, %arg7: memref<8x128xf32, #tpu.memory_space<vmem>>, %arg8: memref<8x128xf32, #tpu.memory_space<vmem>>, %arg9: memref<8x128xf32, #tpu.memory_space<vmem>>, %arg10: memref<1x8x128xf32, #tpu.memory_space<vmem>>) attributes {dimension_semantics = [#tpu.dimension_semantics<parallel>], iteration_bounds = array<i64: 1>, scalar_prefetch = 0 : i64, scratch_operands = 0 : i64, tpu.core_type = #tpu.core_type<tc>, window_params = [{transform_indices = @transform_0, window_bounds = array<i64: 10>}, {transform_indices = @transform_1, window_bounds = array<i64: 8, 8>}, {transform_indices = @transform_2, window_bounds = array<i64: 8, 16>}, {transform_indices = @transform_3, window_bounds = array<i64: 8, 16>}, {pipeline_mode = #tpu.pipeline_mode<synchronous>, transform_indices = @transform_4, window_bounds = array<i64: 16, 128>}, {transform_indices = @transform_5, window_bounds = array<i64: 8, 128>}, {transform_indices = @transform_6, window_bounds = array<i64: 8, 128>}, {transform_indices = @transform_7, window_bounds = array<i64: 8, 128>}, {transform_indices = @transform_8, window_bounds = array<i64: 8, 128>}, {transform_indices = @transform_9, window_bounds = array<i64: 1, 8, 128>}]} {
    %c8 = arith.constant 8 : index
    %0 = memref.load %arg1[%c8] : memref<10xf32, #tpu.memory_space<smem>>
    %c9 = arith.constant 9 : index
    %1 = memref.load %arg1[%c9] : memref<10xf32, #tpu.memory_space<smem>>
    %c0 = arith.constant 0 : index
    %c0_0 = arith.constant 0 : index
    %2 = vector.load %arg2[%c0, %c0_0] : memref<8x8xf32, #tpu.memory_space<vmem>>, vector<8x1xf32>
    %c0_1 = arith.constant 0 : index
    %c1 = arith.constant 1 : index
    %3 = vector.load %arg2[%c0_1, %c1] : memref<8x8xf32, #tpu.memory_space<vmem>>, vector<8x1xf32>
    %c0_2 = arith.constant 0 : index
    %c2 = arith.constant 2 : index
    %4 = vector.load %arg2[%c0_2, %c2] : memref<8x8xf32, #tpu.memory_space<vmem>>, vector<8x1xf32>
    %c0_3 = arith.constant 0 : index
    %c3 = arith.constant 3 : index
    %5 = vector.load %arg2[%c0_3, %c3] : memref<8x8xf32, #tpu.memory_space<vmem>>, vector<8x1xf32>
    %c0_4 = arith.constant 0 : index
    %c4 = arith.constant 4 : index
    %6 = vector.load %arg2[%c0_4, %c4] : memref<8x8xf32, #tpu.memory_space<vmem>>, vector<8x1xf32>
    %c0_5 = arith.constant 0 : index
    %c5 = arith.constant 5 : index
    %7 = vector.load %arg2[%c0_5, %c5] : memref<8x8xf32, #tpu.memory_space<vmem>>, vector<8x1xf32>
    %c0_6 = arith.constant 0 : index
    %c6 = arith.constant 6 : index
    %8 = vector.load %arg2[%c0_6, %c6] : memref<8x8xf32, #tpu.memory_space<vmem>>, vector<8x1xf32>
    %c0_7 = arith.constant 0 : index
    %c0_8 = arith.constant 0 : index
    %9 = vector.load %arg5[%c0_7, %c0_8] : memref<16x128xf32, #tpu.memory_space<vmem>>, vector<16x128xf32>
    %10 = arith.truncf %9 : vector<16x128xf32> to vector<16x128xbf16>
    %c0_9 = arith.constant 0 : index
    %c0_10 = arith.constant 0 : index
    %11 = vector.load %arg3[%c0_9, %c0_10] : memref<8x16xf32, #tpu.memory_space<vmem>>, vector<8x16xf32>
    %12 = arith.truncf %11 : vector<8x16xf32> to vector<8x16xbf16>
    %cst = arith.constant dense<0.000000e+00> : vector<8x128xf32>
    %13 = tpu.matmul %12, %10, %cst {dimension_numbers = #tpu.dot_dimension_numbers<[1], [0], [0], [1], [0, 0, 1, 1], [], []>} : vector<8x16xbf16>, vector<16x128xbf16>, vector<8x128xf32> -> vector<8x128xf32>
    %c0_11 = arith.constant 0 : index
    %c0_12 = arith.constant 0 : index
    %14 = vector.load %arg4[%c0_11, %c0_12] : memref<8x16xf32, #tpu.memory_space<vmem>>, vector<8x16xf32>
    %15 = arith.truncf %14 : vector<8x16xf32> to vector<8x16xbf16>
    %cst_13 = arith.constant dense<0.000000e+00> : vector<8x128xf32>
    %16 = tpu.matmul %15, %10, %cst_13 {dimension_numbers = #tpu.dot_dimension_numbers<[1], [0], [0], [1], [0, 0, 1, 1], [], []>} : vector<8x16xbf16>, vector<16x128xbf16>, vector<8x128xf32> -> vector<8x128xf32>
    %c0_14 = arith.constant 0 : index
    %c0_15 = arith.constant 0 : index
    %17 = vector.load %arg6[%c0_14, %c0_15] : memref<8x128xf32, #tpu.memory_space<vmem>>, vector<8x128xf32>
    %18 = vector.broadcast %0 : f32 to vector<8x128xf32>
    %19 = arith.mulf %17, %18 : vector<8x128xf32>
    %20 = arith.addf %19, %13 : vector<8x128xf32>
    %c0_16 = arith.constant 0 : index
    %c0_17 = arith.constant 0 : index
    %21 = vector.load %arg7[%c0_16, %c0_17] : memref<8x128xf32, #tpu.memory_space<vmem>>, vector<8x128xf32>
    %22 = vector.broadcast %1 : f32 to vector<8x128xf32>
    %23 = arith.mulf %21, %22 : vector<8x128xf32>
    %24 = arith.addf %23, %16 : vector<8x128xf32>
    %c0_18 = arith.constant 0 : index
    %c0_19 = arith.constant 0 : index
    %25 = vector.load %arg8[%c0_18, %c0_19] : memref<8x128xf32, #tpu.memory_space<vmem>>, vector<8x128xf32>
    %c0_20 = arith.constant 0 : index
    %c0_21 = arith.constant 0 : index
    %26 = vector.load %arg9[%c0_20, %c0_21] : memref<8x128xf32, #tpu.memory_space<vmem>>, vector<8x128xf32>
    %27 = vector.broadcast %2 : vector<8x1xf32> to vector<8x128xf32>
    %28 = arith.mulf %27, %20 : vector<8x128xf32>
    %29 = vector.broadcast %3 : vector<8x1xf32> to vector<8x128xf32>
    %30 = arith.mulf %29, %25 : vector<8x128xf32>
    %31 = arith.addf %28, %30 : vector<8x128xf32>
    %32 = vector.broadcast %2 : vector<8x1xf32> to vector<8x128xf32>
    %33 = arith.mulf %32, %24 : vector<8x128xf32>
    %34 = vector.broadcast %3 : vector<8x1xf32> to vector<8x128xf32>
    %35 = arith.mulf %34, %26 : vector<8x128xf32>
    %36 = arith.addf %33, %35 : vector<8x128xf32>
    %37 = vector.broadcast %2 : vector<8x1xf32> to vector<8x128xf32>
    %38 = arith.mulf %37, %25 : vector<8x128xf32>
    %39 = vector.broadcast %3 : vector<8x1xf32> to vector<8x128xf32>
    %40 = arith.mulf %39, %20 : vector<8x128xf32>
    %41 = arith.subf %38, %40 : vector<8x128xf32>
    %42 = vector.broadcast %2 : vector<8x1xf32> to vector<8x128xf32>
    %43 = arith.mulf %42, %26 : vector<8x128xf32>
    %44 = vector.broadcast %3 : vector<8x1xf32> to vector<8x128xf32>
    %45 = arith.mulf %44, %24 : vector<8x128xf32>
    %46 = arith.subf %43, %45 : vector<8x128xf32>
    %c0_22 = arith.constant 0 : index
    %47 = memref.load %arg1[%c0_22] : memref<10xf32, #tpu.memory_space<smem>>
    %48 = vector.broadcast %47 : f32 to vector<8x128xf32>
    %49 = arith.mulf %48, %31 : vector<8x128xf32>
    %c1_23 = arith.constant 1 : index
    %50 = memref.load %arg1[%c1_23] : memref<10xf32, #tpu.memory_space<smem>>
    %51 = vector.broadcast %50 : f32 to vector<8x128xf32>
    %52 = arith.mulf %51, %36 : vector<8x128xf32>
    %53 = arith.addf %49, %52 : vector<8x128xf32>
    %54 = vector.broadcast %4 : vector<8x1xf32> to vector<8x128xf32>
    %55 = arith.addf %53, %54 : vector<8x128xf32>
    %c2_24 = arith.constant 2 : index
    %56 = memref.load %arg1[%c2_24] : memref<10xf32, #tpu.memory_space<smem>>
    %57 = vector.broadcast %56 : f32 to vector<8x128xf32>
    %58 = arith.mulf %57, %31 : vector<8x128xf32>
    %c3_25 = arith.constant 3 : index
    %59 = memref.load %arg1[%c3_25] : memref<10xf32, #tpu.memory_space<smem>>
    %60 = vector.broadcast %59 : f32 to vector<8x128xf32>
    %61 = arith.mulf %60, %36 : vector<8x128xf32>
    %62 = arith.addf %58, %61 : vector<8x128xf32>
    %63 = vector.broadcast %5 : vector<8x1xf32> to vector<8x128xf32>
    %64 = arith.addf %62, %63 : vector<8x128xf32>
    %c4_26 = arith.constant 4 : index
    %65 = memref.load %arg1[%c4_26] : memref<10xf32, #tpu.memory_space<smem>>
    %66 = vector.broadcast %65 : f32 to vector<8x128xf32>
    %67 = arith.mulf %66, %31 : vector<8x128xf32>
    %c5_27 = arith.constant 5 : index
    %68 = memref.load %arg1[%c5_27] : memref<10xf32, #tpu.memory_space<smem>>
    %69 = vector.broadcast %68 : f32 to vector<8x128xf32>
    %70 = arith.mulf %69, %36 : vector<8x128xf32>
    %71 = arith.addf %67, %70 : vector<8x128xf32>
    %72 = vector.broadcast %6 : vector<8x1xf32> to vector<8x128xf32>
    %73 = arith.addf %71, %72 : vector<8x128xf32>
    %cst_28 = arith.constant -1.000000e+01 : f32
    %cst_29 = arith.constant 2.000000e+00 : f32
    %74 = vector.broadcast %cst_28 : f32 to vector<8x128xf32>
    %75 = arith.maximumf %74, %73 : vector<8x128xf32>
    %76 = vector.broadcast %cst_29 : f32 to vector<8x128xf32>
    %77 = arith.minimumf %76, %75 : vector<8x128xf32>
    %c6_30 = arith.constant 6 : index
    %78 = memref.load %arg1[%c6_30] : memref<10xf32, #tpu.memory_space<smem>>
    %79 = vector.broadcast %78 : f32 to vector<8x128xf32>
    %80 = arith.mulf %79, %31 : vector<8x128xf32>
    %c7 = arith.constant 7 : index
    %81 = memref.load %arg1[%c7] : memref<10xf32, #tpu.memory_space<smem>>
    %82 = vector.broadcast %81 : f32 to vector<8x128xf32>
    %83 = arith.mulf %82, %36 : vector<8x128xf32>
    %84 = arith.addf %80, %83 : vector<8x128xf32>
    %85 = vector.broadcast %7 : vector<8x1xf32> to vector<8x128xf32>
    %86 = arith.addf %84, %85 : vector<8x128xf32>
    %cst_31 = arith.constant -1.000000e+01 : f32
    %cst_32 = arith.constant 2.000000e+00 : f32
    %87 = vector.broadcast %cst_31 : f32 to vector<8x128xf32>
    %88 = arith.maximumf %87, %86 : vector<8x128xf32>
    %89 = vector.broadcast %cst_32 : f32 to vector<8x128xf32>
    %90 = arith.minimumf %89, %88 : vector<8x128xf32>
    %91 = arith.subf %55, %41 : vector<8x128xf32>
    %92 = arith.subf %64, %46 : vector<8x128xf32>
    %93 = arith.mulf %91, %91 : vector<8x128xf32>
    %94 = arith.mulf %92, %92 : vector<8x128xf32>
    %95 = arith.addf %93, %94 : vector<8x128xf32>
    %cst_33 = arith.constant 0.000000e+00 : f32
    %96 = vector.broadcast %cst_33 : f32 to vector<8x128xf32>
    %97 = arith.subf %96, %77 : vector<8x128xf32>
    %98 = math.exp %97 : vector<8x128xf32>
    %99 = arith.mulf %93, %98 : vector<8x128xf32>
    %100 = arith.addf %99, %77 : vector<8x128xf32>
    %cst_34 = arith.constant 0.000000e+00 : f32
    %101 = vector.broadcast %cst_34 : f32 to vector<8x128xf32>
    %102 = arith.subf %101, %90 : vector<8x128xf32>
    %103 = math.exp %102 : vector<8x128xf32>
    %104 = arith.mulf %94, %103 : vector<8x128xf32>
    %105 = arith.addf %100, %104 : vector<8x128xf32>
    %106 = arith.addf %105, %90 : vector<8x128xf32>
    %cst_35 = arith.constant 3.67575407 : f32
    %107 = vector.broadcast %cst_35 : f32 to vector<8x128xf32>
    %108 = arith.addf %106, %107 : vector<8x128xf32>
    %cst_36 = arith.constant 5.000000e-01 : f32
    %109 = vector.broadcast %cst_36 : f32 to vector<8x128xf32>
    %110 = arith.mulf %109, %108 : vector<8x128xf32>
    %111 = vector.broadcast %8 : vector<8x1xf32> to vector<8x128xf32>
    %112 = arith.mulf %95, %111 : vector<8x128xf32>
    %113 = vector.broadcast %8 : vector<8x1xf32> to vector<8x128xf32>
    %114 = arith.mulf %110, %113 : vector<8x128xf32>
    %cst_37 = arith.constant dense<0.000000e+00> : vector<128xf32>
    %115 = vector.multi_reduction <add>, %112, %cst_37 [0] : vector<8x128xf32> to vector<128xf32>
    %116 = vector.shape_cast %115 : vector<128xf32> to vector<1x128xf32>
    %cst_38 = arith.constant dense<0.000000e+00> : vector<128xf32>
    %117 = vector.multi_reduction <add>, %114, %cst_38 [0] : vector<8x128xf32> to vector<128xf32>
    %118 = vector.shape_cast %117 : vector<128xf32> to vector<1x128xf32>
    %119 = tpu.iota {dimensions = array<i32: 0>} : vector<8x128xi32>
    %c0_i32 = arith.constant 0 : i32
    %120 = vector.broadcast %c0_i32 : i32 to vector<8x128xi32>
    %121 = arith.cmpi eq, %119, %120 : vector<8x128xi32>
    %cst_39 = arith.constant 0.000000e+00 : f32
    %122 = vector.shape_cast %116 : vector<1x128xf32> to vector<1x128xf32>
    %123 = vector.broadcast %122 : vector<1x128xf32> to vector<8x128xf32>
    %124 = vector.broadcast %cst_39 : f32 to vector<8x128xf32>
    %125 = arith.select %121, %123, %124 : vector<8x128xi1>, vector<8x128xf32>
    %c1_i32 = arith.constant 1 : i32
    %126 = vector.broadcast %c1_i32 : i32 to vector<8x128xi32>
    %127 = arith.cmpi eq, %119, %126 : vector<8x128xi32>
    %cst_40 = arith.constant 0.000000e+00 : f32
    %128 = vector.shape_cast %118 : vector<1x128xf32> to vector<1x128xf32>
    %129 = vector.broadcast %128 : vector<1x128xf32> to vector<8x128xf32>
    %130 = vector.broadcast %cst_40 : f32 to vector<8x128xf32>
    %131 = arith.select %127, %129, %130 : vector<8x128xi1>, vector<8x128xf32>
    %132 = arith.addf %125, %131 : vector<8x128xf32>
    %c0_41 = arith.constant 0 : index
    %c0_42 = arith.constant 0 : index
    %c0_43 = arith.constant 0 : index
    %133 = vector.load %arg10[%c0_41, %c0_42, %c0_43] : memref<1x8x128xf32, #tpu.memory_space<vmem>>, vector<1x8x128xf32>
    %134 = vector.shape_cast %133 : vector<1x8x128xf32> to vector<8x128xf32>
    %135 = vector.shape_cast %132 : vector<8x128xf32> to vector<1x8x128xf32>
    tpu.vector_store %arg10[%c0_41, %c0_42, %c0_43], %135 {strides = array<i32>} : memref<1x8x128xf32, #tpu.memory_space<vmem>>, vector<1x8x128xf32>,
    return
  }
  func.func @transform_0(%arg0: i32) -> i32 {
    %c0_i32 = arith.constant 0 : i32
    %c0_i32_0 = arith.constant 0 : i32
    return %c0_i32 : i32
  }
  func.func @transform_1(%arg0: i32) -> (i32, i32) {
    %c0_i32 = arith.constant 0 : i32
    %c0_i32_0 = arith.constant 0 : i32
    return %arg0, %c0_i32 : i32, i32
  }
  func.func @transform_2(%arg0: i32) -> (i32, i32) {
    %c0_i32 = arith.constant 0 : i32
    %c0_i32_0 = arith.constant 0 : i32
    return %arg0, %c0_i32 : i32, i32
  }
  func.func @transform_3(%arg0: i32) -> (i32, i32) {
    %c0_i32 = arith.constant 0 : i32
    %c0_i32_0 = arith.constant 0 : i32
    return %arg0, %c0_i32 : i32, i32
  }
  func.func @transform_4(%arg0: i32) -> (i32, i32) {
    %c0_i32 = arith.constant 0 : i32
    %c0_i32_0 = arith.constant 0 : i32
    %c0_i32_1 = arith.constant 0 : i32
    return %c0_i32, %c0_i32_0 : i32, i32
  }
  func.func @transform_5(%arg0: i32) -> (i32, i32) {
    %c0_i32 = arith.constant 0 : i32
    %c0_i32_0 = arith.constant 0 : i32
    return %arg0, %c0_i32 : i32, i32
  }
  func.func @transform_6(%arg0: i32) -> (i32, i32) {
    %c0_i32 = arith.constant 0 : i32
    %c0_i32_0 = arith.constant 0 : i32
    return %arg0, %c0_i32 : i32, i32
  }
  func.func @transform_7(%arg0: i32) -> (i32, i32) {
    %c0_i32 = arith.constant 0 : i32
    %c0_i32_0 = arith.constant 0 : i32
    return %arg0, %c0_i32 : i32, i32
  }
  func.func @transform_8(%arg0: i32) -> (i32, i32) {
    %c0_i32 = arith.constant 0 : i32
    %c0_i32_0 = arith.constant 0 : i32
    return %arg0, %c0_i32 : i32, i32
  }
  func.func @transform_9(%arg0: i32) -> (i32, i32, i32) {
    %c0_i32 = arith.constant 0 : i32
    %c0_i32_0 = arith.constant 0 : i32
    %c0_i32_1 = arith.constant 0 : i32
    return %arg0, %c0_i32, %c0_i32_0 : i32, i32, i32
  }
}

</mosaic_0001>

<bundles_post_ra>
// kernel: tpu_custom_call.1
= control target key start
LH: loop header
LB: loop body
LE: loop exit
PB: predicated region body
PF: predicated region fallthrough
CT: control target
= control target key end

     0   :  { %14 = vsyncpa [#allocation5], 0  ;;  %s744_s0 = inlined_call_operand.hbm [shape: f32[10], index: 0, kind: input, shape index: {}]   ;;  %s745_s1 = inlined_call_operand.hbm [shape: f32[8,8], index: 1, kind: input, shape index: {}]   ;;  %s746_s2 = inlined_call_operand.hbm [shape: f32[8,16], index: 2, kind: input, shape index: {}]   ;;  %s747_s3 = inlined_call_operand.vmem [shape: f32[8,16], index: 3, kind: input, shape index: {}]   ;;  %s748_s4 = inlined_call_operand.hbm [shape: f32[16,128], index: 4, kind: input, shape index: {}]   ;;  %s749_s5 = inlined_call_operand.vmem [shape: f32[8,128], index: 5, kind: input, shape index: {}]   ;;  %s750_s6 = inlined_call_operand.hbm [shape: f32[8,128], index: 6, kind: input, shape index: {}]   ;;  %s751_s7 = inlined_call_operand.vmem [shape: f32[8,128], index: 7, kind: input, shape index: {}]   ;;  %s752_s8 = inlined_call_operand.hbm [shape: f32[8,128], index: 8, kind: input, shape index: {}]   ;;  %s753_s9 = inlined_call_operand.hbm [shape: f32[1,8,128], index: 9, kind: output, shape index: {}]  }
   0x1   :  { %15 = vsyncpa [#allocation3], 0 }
   0x2   :  { %16 = vsyncpa [#allocation8], 0 }
   0x3   :  { %17 = vsyncpa [#allocation11], 0 }
   0x4   :  { %18 = vsyncpa [#allocation4], 0  ;;  %s556_s30 = smov [#allocation7]   ;;  %s557_s11 = smov [#allocation10]  }
   0x5   :  { %s43_s10 = sshll.u32 %s556_s30, 4  ;;  %s69_s12 = sshll.u32 %s557_s11, 4  ;;  %s44_s10 = int_to_ptr.vmem [resolvable:$true] %s43_s10  ;;  %s70_s12 = int_to_ptr.vmem [resolvable:$true] %s69_s12 }
   0x6   :  { %s404_s15 = scalar_lea.hbm %s746_s2, 128 }
   0x7   :  { %p405_p0 = scmp.ne.s32.totalorder %s746_s2, %s404_s15  ;;  %p408_p1 = scmp.lt.u32.totalorder %s404_s15, %s746_s2 }
   0x9   :  { %p410_p2 = pnand %p408_p1, %p405_p0 }
   0xb   :  { %413 = shalt.err (!%p410_p2)
}
   0xc   :  { %s414_s20 = scalar_lea.vmem %s44_s10, 128  ;;  %p419_p4 = scmp.lt.s32.totalorder %s44_s10, %s44_s10 }
   0xd   :  { %p415_p3 = scmp.ne.s32.totalorder %s44_s10, %s414_s20  ;;  %p420_p5 = scmp.lt.s32.totalorder %s414_s20, %s414_s20 }
   0xf   :  { %p421_p6 = por %p420_p5, %p419_p4 }
  0x11   :  { %p422_p7 = pnand %p421_p6, %p415_p3 }
  0x13   :  { %425 = shalt.err (!%p422_p7)
}
  0x14   :  { %46 = dma.hbm_to_vmem [thread:$0]  %s746_s2, 128, %s44_s10, [#allocation8]  }
  0x15   :  { %s426_s25 = scalar_lea.hbm %s750_s6, 128 }
  0x16   :  { %p427_p8 = scmp.ne.s32.totalorder %s750_s6, %s426_s25  ;;  %p430_p9 = scmp.lt.u32.totalorder %s426_s25, %s750_s6 }
  0x18   :  { %p432_p10 = pnand %p430_p9, %p427_p8 }
  0x1a   :  { %435 = shalt.err (!%p432_p10)
}
  0x1b   :  { %s436_s30 = scalar_lea.vmem %s70_s12, 128  ;;  %p441_p12 = scmp.lt.s32.totalorder %s70_s12, %s70_s12 }
  0x1c   :  { %p437_p11 = scmp.ne.s32.totalorder %s70_s12, %s436_s30  ;;  %p442_p13 = scmp.lt.s32.totalorder %s436_s30, %s436_s30 }
  0x1e   :  { %p443_p0 = por %p442_p13, %p441_p12 }
  0x20   :  { %p444_p1 = pnand %p443_p0, %p437_p11 }
  0x22   :  { %447 = shalt.err (!%p444_p1)
}
  0x23   :  { %72 = dma.hbm_to_vmem [thread:$0]  %s750_s6, 128, %s70_s12, [#allocation11]  }
  0x24   :  { %s448_s14 = scalar_lea.hbm %s744_s0, 16 }
  0x25   :  { %p449_p2 = scmp.ne.s32.totalorder %s744_s0, %s448_s14  ;;  %p452_p3 = scmp.lt.u32.totalorder %s448_s14, %s744_s0 }
  0x27   :  { %p454_p4 = pnand %p452_p3, %p449_p2 }
  0x29   :  { %457 = shalt.err (!%p454_p4)
}
  0x2a   :  { %s558_s19 = smov [#allocation2]   ;;  %s559_s6 = smov [#allocation6]  }
  0x2b   :  { %26 = dma.hbm_to_smem %s744_s0, 16, %s558_s19, [#allocation5]  }
  0x2c   :  { %s33_s12 = sshll.u32 %s559_s6, 4  ;;  %s560_s22 = smov [#allocation9]   ;;  %s34_s12 = int_to_ptr.vmem [resolvable:$true] %s33_s12 }
  0x2d   :  { %s54_s23 = sshll.u32 %s560_s22, 4  ;;  %s458_s26 = scalar_lea.hbm %s745_s1, 128  ;;  %s55_s23 = int_to_ptr.vmem [resolvable:$true] %s54_s23 }
  0x2e   :  { %p459_p5 = scmp.ne.s32.totalorder %s745_s1, %s458_s26  ;;  %p462_p6 = scmp.lt.u32.totalorder %s458_s26, %s745_s1 }
  0x30   :  { %p464_p7 = pnand %p462_p6, %p459_p5 }
  0x32   :  { %467 = shalt.err (!%p464_p7)
}
  0x33   :  { %s468_s0 = scalar_lea.vmem %s34_s12, 128  ;;  %p473_p9 = scmp.lt.s32.totalorder %s34_s12, %s34_s12 }
  0x34   :  { %p469_p8 = scmp.ne.s32.totalorder %s34_s12, %s468_s0  ;;  %p474_p10 = scmp.lt.s32.totalorder %s468_s0, %s468_s0 }
  0x36   :  { %p475_p11 = por %p474_p10, %p473_p9 }
  0x38   :  { %p476_p12 = pnand %p475_p11, %p469_p8 }
  0x3a   :  { %479 = shalt.err (!%p476_p12)
}
  0x3b   :  { %36 = dma.hbm_to_vmem [thread:$0]  %s745_s1, 128, %s34_s12, [#allocation3]  }
  0x3c   :  { %s480_s14 = scalar_lea.hbm %s748_s4, 256 }
  0x3d   :  { %p481_p13 = scmp.ne.s32.totalorder %s748_s4, %s480_s14  ;;  %p484_p0 = scmp.lt.u32.totalorder %s480_s14, %s748_s4 }
  0x3f   :  { %p486_p1 = pnand %p484_p0, %p481_p13 }
  0x41   :  { %489 = shalt.err (!%p486_p1)
}
  0x42   :  { %s490_s19 = scalar_lea.vmem %s55_s23, 256  ;;  %p495_p3 = scmp.lt.s32.totalorder %s55_s23, %s55_s23 }
  0x43   :  { %p491_p2 = scmp.ne.s32.totalorder %s55_s23, %s490_s19  ;;  %p496_p4 = scmp.lt.s32.totalorder %s490_s19, %s490_s19 }
  0x45   :  { %p497_p5 = por %p496_p4, %p495_p3 }
  0x47   :  { %p498_p6 = pnand %p497_p5, %p491_p2 }
  0x49   :  { %501 = shalt.err (!%p498_p6)
}
  0x4a   :  { %s561_s1 = smov 128   ;;  %s562_s20 = smov 8  }
  0x4b   :  { %60 = dma.hbm_to_vmem [thread:$0]  %s748_s4, 256, %s55_s23, [#allocation8], %s561_s1, %s561_s1, %s562_s20  }
  0x4c   :  { %s563_s12 = smov [#allocation12]   ;;  %s502_s26 = scalar_lea.hbm %s752_s8, 128 }
  0x4d   :  { %s81_s22 = sshll.u32 %s563_s12, 4  ;;  %p503_p7 = scmp.ne.s32.totalorder %s752_s8, %s502_s26  ;;  %s82_s22 = int_to_ptr.vmem [resolvable:$true] %s81_s22 }
  0x4e   :  { %p506_p8 = scmp.lt.u32.totalorder %s502_s26, %s752_s8 }
  0x50   :  { %p508_p9 = pnand %p506_p8, %p503_p7 }
  0x52   :  { %511 = shalt.err (!%p508_p9)
}
  0x53   :  { %s512_s0 = scalar_lea.vmem %s82_s22, 128  ;;  %p517_p11 = scmp.lt.s32.totalorder %s82_s22, %s82_s22 }
  0x54   :  { %p513_p10 = scmp.ne.s32.totalorder %s82_s22, %s512_s0  ;;  %p518_p12 = scmp.lt.s32.totalorder %s512_s0, %s512_s0 }
  0x56   :  { %p519_p13 = por %p518_p12, %p517_p11 }
  0x58   :  { %p520_p0 = pnand %p519_p13, %p513_p10 }
  0x5a   :  { %523 = shalt.err (!%p520_p0)
}
  0x5b   :  { %84 = dma.hbm_to_vmem [thread:$0]  %s752_s8, 128, %s82_s22, [#allocation11]  }
  0x5c   :  { %546 = dma.done.wait [#allocation5], 16  }
  0x5d   :  { %547 = vsyncadd [#allocation5], 4294967280 }
  0x5e   :  { %548 = dma.done.wait [#allocation3], 128  }
  0x5f   :  { %549 = vsyncadd [#allocation3], 4294967168 }
  0x60   :  { %550 = dma.done.wait [#allocation8], 384  }
  0x61   :  { %551 = vsyncadd [#allocation8], 4294966912 }
  0x62   :  { %552 = dma.done.wait [#allocation11], 256  }
  0x63   :  { %553 = vsyncadd [#allocation11], 4294967040 }
  0x64   :  { %103 = sfence }
  0x65   :  { %v108_v0 = vld [vmem:[#allocation9] sm:$0xff]  ;;  %v109_v1 = vld [vmem:[#allocation9 + $0x8] sm:$0xff]  ;;  %v111_v2 = vld [vmem:[#allocation7] sm:$0xff]  ;;  %v564_v3 = vmov 0.0   ;;  %vm565_vm0 = vmmov 0   ;;  %vm113_vm1 = vcmask 130048  }
  0x66   :  { %362 = vmatprep.subr.bf16.mxu0 %v564_v3  ;;  %368 = vmatprep.subr.bf16.mxu1 %v564_v3  ;;  %v110_v4 = vpack.c.bf16 %v109_v1, %v108_v0  ;;  %v157_v5 = vld [vmem:[%s747_s3] sm:$0xff]  ;;  %v112_v6 = vpack.c.bf16 %v111_v2, %v111_v2  ;;  %v107_v8 = vld [vmem:[#allocation6] sm:$0xff]  ;;  %v566_v9 = vmov 0   ;;  %v567_v10 = vmov 4   ;;  %s347_s3 = sld [smem:[#allocation2 + $0x8]]  ;;  %s348_s8 = sld [smem:[#allocation2 + $0x9]] }
  0x67   :  { %364 = vmatprep.mubr.msk.bf16.mxu0 %vm565_vm0, %v564_v3  ;;  %370 = vmatprep.mubr.msk.bf16.mxu1 %vm565_vm0, %v564_v3  ;;  %v158_v7 = vpack.c.bf16 %v157_v5, %v157_v5  ;;  %v568_v11 = vmov 1   ;;  %v569_v12 = vmov 5   ;;  %v570_v13 = vmov 2   ;;  %v202_v18 = vld [vmem:[%s749_s5] sm:$0xff]  ;;  %v206_v20 = vld [vmem:[#allocation10] sm:$0xff]  ;;  %s704_s14 = sld [smem:[#allocation2 + $0x6]] }
  0x68   :  { %363 = vmatpush3.bf16.msra.mxu0 %v110_v4  ;;  %369 = vmatpush3.bf16.msra.mxu1 %v110_v4  ;;  %v571_v14 = vmov 3   ;;  %v572_v15 = vmov 6   ;;  %s706_s15 = sld [smem:[#allocation2 + $0x7]]  ;;  %s708_s16 = sld [smem:[#allocation2]]  ;;  %v210_v26 = vld [vmem:[%s751_s7] sm:$0xff] }
  0x69   :  { %392 = vset.pattern.permute.xlu0 %v566_v9  ;;  %394 = vset.pattern.permute.xlu1 %v567_v10  ;;  %s710_s17 = sld [smem:[#allocation2 + $0x1]]  ;;  %s712_s18 = sld [smem:[#allocation2 + $0x4]]  ;;  %v211_v27 = vld [vmem:[#allocation12] sm:$0xff] }
  0x6a   :  { %214 = vperm.xlu0 %392, %v107_v8   ;;  %265 = vperm.xlu1 %394, %v107_v8   ;;  %s714_s19 = sld [smem:[#allocation2 + $0x5]]  ;;  %s716_s1 = sld [smem:[#allocation2 + $0x2]] }
  0x6b   :  { %365 = vmatmul.mubr.msk.bf16.vlgmr.msra.gmra.mrb[0].mxu0 %vm113_vm1, %v112_v6  ;;  %371 = vmatmul.mubr.msk.bf16.vlgmr.msra.gmra.mrb[0].mxu1 %vm113_vm1, %v158_v7  ;;  %s718_s5 = sld [smem:[#allocation2 + $0x3]]  ;;  %s573_s7 = smov [#allocation13]  }
  0x6c   :  { %v203_v19 = vstv %s347_s3  ;;  %v207_v21 = vstv %s348_s8  ;;  %s335_s6 = sshll.u32 %s573_s7, 4  ;;  %s336_s6 = int_to_ptr.vmem [resolvable:$true] %s335_s6 }
  0x6d   :  { %v204_v22 = vmul.f32 %v203_v19, %v202_v18  ;;  %v208_v23 = vmul.f32 %v207_v21, %v206_v20  ;;  %v272_v42 = vstv %s704_s14  ;;  %s524_s12 = scalar_lea.vmem %s336_s6, 128  ;;  %p529_p2 = scmp.lt.s32.totalorder %s336_s6, %s336_s6 }
  0x6e   :  { %393 = vset.pattern.permute.xlu0 %v568_v11  ;;  %395 = vset.pattern.permute.xlu1 %v569_v12  ;;  %v275_v43 = vstv %s706_s15  ;;  %v234_v44 = vstv %s708_s16  ;;  %p525_p1 = scmp.ne.s32.totalorder %s336_s6, %s524_s12  ;;  %p530_p3 = scmp.lt.s32.totalorder %s524_s12, %s524_s12 }
  0x6f   :  { %219 = vperm.xlu0 %393, %v107_v8   ;;  %279 = vperm.xlu1 %395, %v107_v8   ;;  %v237_v45 = vstv %s710_s17  ;;  %v258_v46 = vstv %s712_s18 }
  0x70   :  { %v261_v47 = vstv %s714_s19  ;;  %v246_v50 = vstv %s716_s1  ;;  %p531_p4 = por %p530_p3, %p529_p2 }
  0x71   :  { %v249_v51 = vstv %s718_s5 }
  0x72   :  { %p532_p5 = pnand %p531_p4, %p525_p1 }
  0x73   :  { %396 = vset.pattern.permute.xlu1 %v570_v13  ;;  %397 = vset.pattern.permute.xlu0 %v571_v14 }
  0x74   :  { %241 = vperm.xlu1 %396, %v107_v8   ;;  %253 = vperm.xlu0 %397, %v107_v8  }
  0x78   :  { %398 = vset.pattern.permute.xlu1 %v572_v15  ;;  %399 = vset.pattern.permute.xlu0 %v572_v15 }
  0x79   :  { %304 = vperm.xlu1 %398, %v107_v8  }
  0xe9   :  { %v215_v16 = vpop.permute.xlu0 %214  ;;  %v699_v17 = vpop.permute.xlu1 %265 }
  0xea   :  { %v227_v63 = vmul.f32 %v215_v16, %v210_v26  ;;  %v230_v3 = vmul.f32 %v215_v16, %v211_v27 }
  0xee   :  { %v220_v24 = vpop.permute.xlu0 %219  ;;  %v280_v25 = vpop.permute.xlu1 %279 }
  0xef   :  { %v222_v34 = vmul.f32 %v220_v24, %v210_v26  ;;  %v225_v35 = vmul.f32 %v220_v24, %v211_v27 }
  0xf3   :  { %v242_v58 = vpop.permute.xlu1 %241  ;;  %v254_v2 = vpop.permute.xlu0 %253 }
 0x13e   :  { %v151_v28 = vpop.f32.mrb[0].mxu0  ;;  %v196_v29 = vpop.f32.mrb[0].mxu1 }
 0x13f   :  { %v205_v30 = vadd.f32 %v204_v22, %v151_v28  ;;  %v209_v31 = vadd.f32 %v208_v23, %v196_v29  ;;  %v366_v32 = vpop.f32.mrb[1].mxu0  ;;  %v372_v33 = vpop.f32.mrb[1].mxu1 }
 0x140   :  { %v154_v36 = vpop.f32.mrb[2].mxu0  ;;  %v199_v37 = vpop.f32.mrb[2].mxu1 }
 0x141   :  { %v217_v38 = vmul.f32 %v215_v16, %v205_v30  ;;  %v224_v39 = vmul.f32 %v215_v16, %v209_v31  ;;  %v367_v40 = vpop.f32.mrb[3].mxu0  ;;  %v373_v41 = vpop.f32.mrb[3].mxu1  ;;  %v228_v52 = vmul.f32 %v220_v24, %v205_v30  ;;  %v231_v53 = vmul.f32 %v220_v24, %v209_v31 }
 0x143   :  { %v223_v48 = vadd.f32 %v222_v34, %v217_v38  ;;  %v226_v49 = vadd.f32 %v225_v35, %v224_v39  ;;  %v229_v7 = vsub.f32 %v227_v63, %v228_v52  ;;  %v232_v10 = vsub.f32 %v230_v3, %v231_v53 }
 0x145   :  { %v273_v54 = vmul.f32 %v272_v42, %v223_v48  ;;  %v276_v55 = vmul.f32 %v275_v43, %v226_v49  ;;  %v235_v56 = vmul.f32 %v234_v44, %v223_v48  ;;  %v238_v57 = vmul.f32 %v237_v45, %v226_v49 }
 0x146   :  { %v259_v59 = vmul.f32 %v258_v46, %v223_v48  ;;  %v262_v60 = vmul.f32 %v261_v47, %v226_v49  ;;  %v247_v61 = vmul.f32 %v246_v50, %v223_v48  ;;  %v250_v62 = vmul.f32 %v249_v51, %v226_v49 }
 0x147   :  { %v277_v0 = vadd.f32 %v276_v55, %v273_v54  ;;  %v239_v1 = vadd.f32 %v238_v57, %v235_v56  ;;  %v321_v42 = vlaneseq }
 0x148   :  { %v263_v4 = vadd.f32 %v262_v60, %v259_v59  ;;  %v251_v5 = vadd.f32 %v250_v62, %v247_v61 }
 0x149   :  { %v282_v6 = vadd.f32 %v280_v25, %v277_v0  ;;  %v244_v8 = vadd.f32 %v242_v58, %v239_v1  ;;  %v305_v25 = vpop.permute.xlu1 %304  ;;  %v322_v46 = vshrl.u32 %v321_v42, 7 }
 0x14a   :  { %v268_v9 = vadd.f32 %v699_v17, %v263_v4  ;;  %v256_v11 = vadd.f32 %v254_v2, %v251_v5 }
 0x14b   :  { %v283_v12 = vmax.f32 %v282_v6, -10.0  ;;  %v285_v13 = vsub.f32 %v244_v8, %v229_v7  ;;  %vm323_vm2 = vcmp.eq.s32.totalorder %v322_v46, 0  ;;  %vm325_vm3 = vcmp.eq.s32.totalorder %v322_v46, 1 }
 0x14c   :  { %v269_v14 = vmax.f32 %v268_v9, -10.0  ;;  %v286_v15 = vsub.f32 %v256_v11, %v232_v10 }
 0x14d   :  { %v284_v18 = vmin.f32 %v283_v12, 2.0  ;;  %v287_v19 = vmul.f32 %v285_v13, %v285_v13 }
 0x14e   :  { %v270_v20 = vmin.f32 %v269_v14, 2.0  ;;  %v288_v21 = vmul.f32 %v286_v15, %v286_v15 }
 0x14f   :  { %v295_v22 = vsub.f32 0.0, %v284_v18 }
 0x150   :  { %v290_v23 = vsub.f32 0.0, %v270_v20  ;;  %v289_v16 = vadd.f32 %v288_v21, %v287_v19 }
 0x151   :  { %v296_v24 = vmul.f32 1.442695, %v295_v22 }
 0x152   :  { %v291_v26 = vmul.f32 1.442695, %v290_v23  ;;  %v307_v17 = vmul.f32 %v305_v25, %v289_v16 }
 0x153   :  { %400 = vpow2.f32 %v296_v24 }
 0x154   :  { %402 = vpow2.f32 %v291_v26  ;;  %v309_v32 = vrot.slane %v307_v17, 4 }
 0x156   :  { %v310_v35 = vadd.f32 %v309_v32, %v307_v17 }
 0x158   :  { %v311_v38 = vrot.slane %v310_v35, 2 }
 0x15a   :  { %v312_v40 = vadd.f32 %v311_v38, %v310_v35 }
 0x15c   :  { %v313_v45 = vrot.slane %v312_v40, 1 }
 0x15d   :  { %v401_v27 = vpop.eup %400 }
 0x15e   :  { %v403_v28 = vpop.eup %402  ;;  %v298_v29 = vmul.f32 %v401_v27, %v288_v21  ;;  %v314_v48 = vadd.f32 %v313_v45, %v312_v40 }
 0x15f   :  { %v293_v30 = vmul.f32 %v403_v28, %v287_v19 }
 0x160   :  { %v324_v51 = vsel %vm323_vm2, %v314_v48, 0.0 }
 0x161   :  { %v294_v31 = vadd.f32 %v293_v30, %v270_v20 }
 0x163   :  { %v299_v33 = vadd.f32 %v298_v29, %v294_v31 }
 0x165   :  { %v300_v34 = vadd.f32 %v299_v33, %v284_v18 }
 0x167   :  { %v301_v36 = vadd.f32 3.675754, %v300_v34 }
 0x169   :  { %v302_v37 = vmul.f32 0.5, %v301_v36 }
 0x16b   :  { %v308_v39 = vmul.f32 %v305_v25, %v302_v37 }
 0x16d   :  { %v315_v41 = vrot.slane %v308_v39, 4 }
 0x16f   :  { %v316_v43 = vadd.f32 %v315_v41, %v308_v39 }
 0x171   :  { %v317_v44 = vrot.slane %v316_v43, 2 }
 0x173   :  { %v318_v47 = vadd.f32 %v317_v44, %v316_v43 }
 0x175   :  { %v319_v49 = vrot.slane %v318_v47, 1 }
 0x177   :  { %v320_v50 = vadd.f32 %v319_v49, %v318_v47 }
 0x179   :  { %v326_v52 = vsel %vm325_vm3, %v320_v50, 0.0 }
 0x17a   :  { %v327_v53 = vadd.f32 %v326_v52, %v324_v51 }
 0x17c   :  { %328 = vst [vmem:[#allocation13] sm:$0xff] %v327_v53 }
 0x17d   :  { %535 = shalt.err (!%p532_p5)
}
 0x17e   :  { %s536_s25 = scalar_lea.hbm %s753_s9, 128 }
 0x17f   :  { %p537_p6 = scmp.ne.s32.totalorder %s753_s9, %s536_s25  ;;  %p540_p7 = scmp.lt.u32.totalorder %s536_s25, %s753_s9 }
 0x181   :  { %p542_p8 = pnand %p540_p7, %p537_p6 }
 0x183   :  { %545 = shalt.err (!%p542_p8)
}
 0x184   :  { %338 = dma.vmem_to_hbm [thread:$0]  %s336_s6, 128, %s753_s9, [#allocation4]  }
 0x185   :  { %554 = dma.done.wait [#allocation4], 128  }
 0x186   :  { %555 = vsyncadd [#allocation4], 4294967168 }
 0x187   :  { %342 = vsyncpa [#allocation3], 1 }
 0x188   :  { %343 = vsyncpa [#allocation8], 1 }
 0x189   :  { %344 = vsyncpa [#allocation11], 1 }
 0x18a   :  { %345 = vsyncpa [#allocation4], 1 }
 0x18b   :  { %346 = vsyncpa [#allocation5], 1 }

</bundles_post_ra>
